<compile_context>
chip_gen: v7x
topology: tpu7x:2x2x1
jax: 0.10.0
libtpu: 0.0.40
codegen_flags: <defaults>
</compile_context>

<pallas_src>
import functools

import jax
import jax.numpy as jnp
from jax import lax
from jax.experimental import pallas as pl
from jax.experimental.pallas import tpu as pltpu


# ----------------------------------------------------------------- pass 1 ----
def _mask_kernel(u_ref, m_ref, *, gamma, block_size, channels):
    """Build the scaled keep-mask.

    u_ref : (B, H, W) uniform [0,1) randoms (f32)
    m_ref : (B, H, W) output: keep_mask * (numel / sum(channel-expanded mask))
    """
    u = u_ref[...]
    B, H, W = u.shape

    # Bernoulli seeds: 1.0 where a block centre is sampled for dropping.
    seed = (u < jnp.float32(gamma)).astype(jnp.float32)

    pad = block_size // 2
    # Hoisted 1-D index grids (rows depend only on H, cols only on W).
    row = lax.broadcasted_iota(jnp.int32, (B, H, W), 1)
    col = lax.broadcasted_iota(jnp.int32, (B, H, W), 2)

    # Separable max_pool2d(kernel=block_size, stride=1, padding=block_size//2):
    # pool along rows first, then along columns of the row-pooled result.
    # Out-of-bounds contributions are masked to 0, which matches the
    # reference's -inf padding because all values are in {0, 1}.
    offsets = [d for d in range(-pad, block_size - pad) if d != 0]

    tmp = seed
    for dy in offsets:
        shifted = pltpu.roll(seed, shift=(-dy) % H, axis=1)
        valid = (row < H - dy) if dy > 0 else (row >= -dy)
        tmp = jnp.maximum(tmp, jnp.where(valid, shifted, 0.0))

    pooled = tmp
    for dx in offsets:
        shifted = pltpu.roll(tmp, shift=(-dx) % W, axis=2)
        valid = (col < W - dx) if dx > 0 else (col >= -dx)
        pooled = jnp.maximum(pooled, jnp.where(valid, shifted, 0.0))

    keep = 1.0 - pooled                                    # (B, H, W), {0, 1}

    # scale = mask.numel() / mask.sum() over the channel-expanded mask;
    # the mask is identical across channels, so sum = C * sum_{B,H,W}.
    numel = jnp.float32(B * channels * H * W)
    mask_sum = jnp.float32(channels) * jnp.sum(keep)
    scale = numel / jnp.maximum(mask_sum, 1.0)             # guard: all dropped

    m_ref[...] = keep * scale


# ----------------------------------------------------------------- pass 2 ----
def _apply_kernel(m_ref, x_ref, o_ref):
    """o = x * scaled_mask (mask broadcast across channels).

    m_ref : (1, 1, HW)   scaled keep mask for this batch
    x_ref : (1, TC, HW)  input tile
    o_ref : (1, TC, HW)  output tile
    """
    o_ref[...] = (x_ref[...] * m_ref[...]).astype(o_ref.dtype)


def _pick_channel_tile(C, HW, itemsize, target_bytes=2 << 20):
    """Largest channel tile that divides C, is a multiple of 8 (layout rule)
    and keeps one (tc, HW) block within ~target_bytes so double-buffered
    in+out blocks stay well inside the scoped-VMEM default on v5e/v6e/v7x."""
    if C <= 8 or C * HW * itemsize <= target_bytes:
        return C
    divs = [tc for tc in range(8, C, 8) if C % tc == 0]
    fitting = [tc for tc in divs if tc * HW * itemsize <= target_bytes]
    if fitting:
        return max(fitting)
    return min(divs) if divs else C


def dropblock2d(x, key, *, block_size, keep_prob, sync_channels=False,
                training=True):
    """JAX/Pallas equivalent of DropBlock2D.forward (NCHW layout).

    `sync_channels` has no numerical effect (repeat vs. expand of the same
    per-batch mask are identical), so it is accepted but unused.
    """
    del sync_channels
    if (not training) or keep_prob == 1.0:
        return x

    # Even block sizes change the spatial shape in the torch module (and break
    # its own broadcast), so only odd block sizes are supported.
    assert block_size % 2 == 1, "block_size must be odd"

    B, C, H, W = x.shape
    HW = H * W
    gamma = (1.0 - keep_prob) / (block_size ** 2)
    gamma *= (H * W) / ((H - block_size + 1) * (W - block_size + 1))

    # torch.rand(B, H, W); the `< gamma` threshold is applied in-kernel.
    # TODO(synk): generate these in-kernel with pltpu.prng_seed/prng_random_bits
    # to remove this (small, B*H*W*4 byte) HBM stream entirely.
    u = jax.random.uniform(key, (B, H, W), dtype=jnp.float32)

    # ---- pass 1: scaled keep mask (tiny, fully VMEM-resident) --------------
    mask = pl.pallas_call(
        functools.partial(_mask_kernel, gamma=gamma, block_size=block_size,
                          channels=C),
        out_shape=jax.ShapeDtypeStruct((B, H, W), jnp.float32),
        in_specs=[pl.BlockSpec(memory_space=pltpu.MemorySpace.VMEM)],
        out_specs=pl.BlockSpec(memory_space=pltpu.MemorySpace.VMEM),
    )(u)

    # ---- pass 2: tiled, lane-dense, grid-pipelined apply --------------------
    itemsize = jnp.dtype(x.dtype).itemsize
    tc = _pick_channel_tile(C, HW, itemsize)

    x3 = x.reshape(B, C, HW)          # lane-dense: last dim is H*W
    m3 = mask.reshape(B, 1, HW)       # broadcast dim kept explicit

    grid = (B, C // tc)
    flops = 2 * B * C * HW
    bytes_accessed = 2 * B * C * HW * itemsize + B * (C // tc) * HW * 4

    out3 = pl.pallas_call(
        _apply_kernel,
        out_shape=jax.ShapeDtypeStruct((B, C, HW), x.dtype),
        grid_spec=pltpu.PrefetchScalarGridSpec(
            num_scalar_prefetch=0,
            grid=grid,
            in_specs=[pl.BlockSpec((1, 1, HW), lambda b, c: (b, 0, 0)),
                      pl.BlockSpec((1, tc, HW), lambda b, c: (b, c, 0))],
            out_specs=pl.BlockSpec((1, tc, HW), lambda b, c: (b, c, 0)),
        ),
        compiler_params=pltpu.CompilerParams(
            dimension_semantics=("parallel", "parallel")),
        cost_estimate=pl.CostEstimate(flops=flops, transcendentals=0,
                                      bytes_accessed=bytes_accessed),
    )(m3, x3)

    return out3.reshape(B, C, H, W)


# ---------------------------------------------------------------- reference --
def _dropblock_reference(x, u, *, block_size, keep_prob):
    """Pure-JAX reference of the torch forward (same randoms u)."""
    B, C, H, W = x.shape
    gamma = (1.0 - keep_prob) / (block_size ** 2)
    gamma *= (H * W) / ((H - block_size + 1) * (W - block_size + 1))
    seed = (u < gamma).astype(jnp.float32)                 # (B, H, W)
    pad = block_size // 2
    pooled = lax.reduce_window(
        seed, -jnp.inf, lax.max,
        window_dimensions=(1, block_size, block_size),
        window_strides=(1, 1, 1),
        padding=((0, 0), (pad, pad), (pad, pad)))
    keep = 1.0 - pooled
    mask = jnp.broadcast_to(keep[:, None, :, :], x.shape)
    return x * mask * (mask.size / jnp.sum(mask))


if __name__ == "__main__":
    key = jax.random.PRNGKey(0)
    kx, km = jax.random.split(key)

    B, C, H, W = 2, 4, 16, 16
    block_size, keep_prob = 3, 0.9

    x = jax.random.normal(kx, (B, C, H, W), dtype=jnp.float32)
    u = jax.random.uniform(km, (B, H, W), dtype=jnp.float32)

    y = dropblock2d(x, km, block_size=block_size, keep_prob=keep_prob,
                    sync_channels=False, training=True)
    jax.block_until_ready(y)

    y_ref = _dropblock_reference(x, u, block_size=block_size,
                                 keep_prob=keep_prob)
    assert y.shape == x.shape and y.dtype == x.dtype
    assert bool(jnp.allclose(y, y_ref, atol=1e-5, rtol=1e-5))

    print("KERNEL_OK")
</pallas_src>

<mosaic_0001>
module attributes {stable_mosaic.version = 11 : i64} {
  func.func @_mask_kernel(%arg0: memref<2x16x16xf32, #tpu.memory_space<vmem>>, %arg1: memref<2x16x16xf32, #tpu.memory_space<vmem>>) attributes {dimension_semantics = [], scalar_prefetch = 0 : i64, scratch_operands = 0 : i64, tpu.core_type = #tpu.core_type<tc>} {
    %c0 = arith.constant 0 : index
    %c0_0 = arith.constant 0 : index
    %c0_1 = arith.constant 0 : index
    %0 = vector.load %arg0[%c0, %c0_0, %c0_1] : memref<2x16x16xf32, #tpu.memory_space<vmem>>, vector<2x16x16xf32>
    %cst = arith.constant 0.0145124719 : f32
    %1 = vector.broadcast %cst : f32 to vector<2x16x16xf32>
    %2 = arith.cmpf olt, %0, %1 : vector<2x16x16xf32>
    %3 = arith.extui %2 : vector<2x16x16xi1> to vector<2x16x16xi32>
    %4 = arith.sitofp %3 : vector<2x16x16xi32> to vector<2x16x16xf32>
    %5 = tpu.iota {dimensions = array<i32: 1>} : vector<2x16x16xi32>
    %6 = tpu.iota {dimensions = array<i32: 2>} : vector<2x16x16xi32>
    %c1_i32 = arith.constant 1 : i32
    %7 = tpu.dynamic_rotate %4 by %c1_i32 dim 1 : vector<2x16x16xf32>, i32 -> vector<2x16x16xf32>
    %c1_i32_2 = arith.constant 1 : i32
    %8 = vector.broadcast %c1_i32_2 : i32 to vector<2x16x16xi32>
    %9 = arith.cmpi sge, %5, %8 : vector<2x16x16xi32>
    %cst_3 = arith.constant 0.000000e+00 : f32
    %10 = vector.broadcast %cst_3 : f32 to vector<2x16x16xf32>
    %11 = arith.select %9, %7, %10 : vector<2x16x16xi1>, vector<2x16x16xf32>
    %12 = arith.maximumf %4, %11 : vector<2x16x16xf32>
    %c15_i32 = arith.constant 15 : i32
    %13 = tpu.dynamic_rotate %4 by %c15_i32 dim 1 : vector<2x16x16xf32>, i32 -> vector<2x16x16xf32>
    %c15_i32_4 = arith.constant 15 : i32
    %14 = vector.broadcast %c15_i32_4 : i32 to vector<2x16x16xi32>
    %15 = arith.cmpi slt, %5, %14 : vector<2x16x16xi32>
    %cst_5 = arith.constant 0.000000e+00 : f32
    %16 = vector.broadcast %cst_5 : f32 to vector<2x16x16xf32>
    %17 = arith.select %15, %13, %16 : vector<2x16x16xi1>, vector<2x16x16xf32>
    %18 = arith.maximumf %12, %17 : vector<2x16x16xf32>
    %c1_i32_6 = arith.constant 1 : i32
    %19 = tpu.dynamic_rotate %18 by %c1_i32_6 dim 2 : vector<2x16x16xf32>, i32 -> vector<2x16x16xf32>
    %c1_i32_7 = arith.constant 1 : i32
    %20 = vector.broadcast %c1_i32_7 : i32 to vector<2x16x16xi32>
    %21 = arith.cmpi sge, %6, %20 : vector<2x16x16xi32>
    %cst_8 = arith.constant 0.000000e+00 : f32
    %22 = vector.broadcast %cst_8 : f32 to vector<2x16x16xf32>
    %23 = arith.select %21, %19, %22 : vector<2x16x16xi1>, vector<2x16x16xf32>
    %24 = arith.maximumf %18, %23 : vector<2x16x16xf32>
    %c15_i32_9 = arith.constant 15 : i32
    %25 = tpu.dynamic_rotate %18 by %c15_i32_9 dim 2 : vector<2x16x16xf32>, i32 -> vector<2x16x16xf32>
    %c15_i32_10 = arith.constant 15 : i32
    %26 = vector.broadcast %c15_i32_10 : i32 to vector<2x16x16xi32>
    %27 = arith.cmpi slt, %6, %26 : vector<2x16x16xi32>
    %cst_11 = arith.constant 0.000000e+00 : f32
    %28 = vector.broadcast %cst_11 : f32 to vector<2x16x16xf32>
    %29 = arith.select %27, %25, %28 : vector<2x16x16xi1>, vector<2x16x16xf32>
    %30 = arith.maximumf %24, %29 : vector<2x16x16xf32>
    %cst_12 = arith.constant 1.000000e+00 : f32
    %31 = vector.broadcast %cst_12 : f32 to vector<2x16x16xf32>
    %32 = arith.subf %31, %30 : vector<2x16x16xf32>
    %33 = vector.shape_cast %32 : vector<2x16x16xf32> to vector<1x2x16x16xf32>
    %cst_13 = arith.constant dense<0.000000e+00> : vector<1xf32>
    %34 = vector.multi_reduction <add>, %33, %cst_13 [1, 2, 3] : vector<1x2x16x16xf32> to vector<1xf32>
    %35 = vector.shape_cast %34 : vector<1xf32> to vector<1x1x1x1xf32>
    %36 = vector.extract %35[0, 0, 0, 0] : f32 from vector<1x1x1x1xf32>
    %cst_14 = arith.constant 4.000000e+00 : f32
    %37 = arith.mulf %cst_14, %36 : f32
    %cst_15 = arith.constant 1.000000e+00 : f32
    %38 = arith.maximumf %37, %cst_15 : f32
    %cst_16 = arith.constant 2.048000e+03 : f32
    %39 = arith.divf %cst_16, %38 : f32
    %40 = vector.broadcast %39 : f32 to vector<2x16x16xf32>
    %41 = arith.mulf %32, %40 : vector<2x16x16xf32>
    %c0_17 = arith.constant 0 : index
    %c0_18 = arith.constant 0 : index
    %c0_19 = arith.constant 0 : index
    %42 = vector.load %arg1[%c0_17, %c0_18, %c0_19] : memref<2x16x16xf32, #tpu.memory_space<vmem>>, vector<2x16x16xf32>
    tpu.vector_store %arg1[%c0_17, %c0_18, %c0_19], %41 {strides = array<i32>} : memref<2x16x16xf32, #tpu.memory_space<vmem>>, vector<2x16x16xf32>,
    return
  }
}

</mosaic_0001>

<bundles_post_ra>
// kernel: tpu_custom_call.1
= control target key start
LH: loop header
LB: loop body
LE: loop exit
PB: predicated region body
PF: predicated region fallthrough
CT: control target
= control target key end

     0   :  { %6 = vsyncpa [#allocation3], 0  ;;  %s399_s0 = inlined_call_operand.hbm [shape: f32[2,16,16], index: 0, kind: input, shape index: {}]   ;;  %s400_s1 = inlined_call_operand.hbm [shape: f32[2,16,16], index: 1, kind: output, shape index: {}]  }
   0x1   :  { %7 = vsyncpa [#allocation4], 0  ;;  %s298_s6 = smov [#allocation2]   ;;  %s250_s10 = scalar_lea.hbm %s399_s0, 512 }
   0x2   :  { %s13_s7 = sshll.u32 %s298_s6, 4  ;;  %p251_p0 = scmp.ne.s32.totalorder %s399_s0, %s250_s10  ;;  %s14_s7 = int_to_ptr.vmem [resolvable:$true] %s13_s7 }
   0x3   :  { %p254_p1 = scmp.lt.u32.totalorder %s250_s10, %s399_s0 }
   0x5   :  { %p256_p2 = pnand %p254_p1, %p251_p0 }
   0x7   :  { %259 = shalt.err (!%p256_p2)
}
   0x8   :  { %s260_s15 = scalar_lea.vmem %s14_s7, 512  ;;  %p265_p4 = scmp.lt.s32.totalorder %s14_s7, %s14_s7 }
   0x9   :  { %p261_p3 = scmp.ne.s32.totalorder %s14_s7, %s260_s15  ;;  %p266_p5 = scmp.lt.s32.totalorder %s260_s15, %s260_s15 }
   0xb   :  { %p267_p6 = por %p266_p5, %p265_p4 }
   0xd   :  { %p268_p7 = pnand %p267_p6, %p261_p3 }
   0xf   :  { %271 = shalt.err (!%p268_p7)
}
  0x10   :  { %s299_s16 = smov 128   ;;  %s300_s17 = smov 8  }
  0x11   :  { %19 = dma.hbm_to_vmem [thread:$0]  %s399_s0, 512, %s14_s7, [#allocation3], %s299_s16, %s299_s16, %s300_s17  }
  0x12   :  { %294 = dma.done.wait [#allocation3], 512  }
  0x13   :  { %295 = vsyncadd [#allocation3], 4294966784  ;;  %v39_v0 = vlaneseq  ;;  %v23_v3 = vld [vmem:[#allocation2] sm:$0xff]  ;;  %v24_v4 = vld [vmem:[#allocation2 + $0x8] sm:$0xff]  ;;  %v301_v7 = vmov 0.0   ;;  %s302_s0 = smov 16  }
  0x14   :  { %v25_v5 = vld [vmem:[#allocation2 + $0x10] sm:$0xff]  ;;  %vm27_vm3 = vcmp.lt.f32.partialorder %v23_v3, 0.014512472  ;;  %vm28_vm4 = vcmp.lt.f32.partialorder %v24_v4, 0.014512472  ;;  %v26_v6 = vld [vmem:[#allocation2 + $0x18] sm:$0xff] }
  0x15   :  { %v40_v1 = vshrl.u32 %v39_v0, 7  ;;  %v206_v8 = vsel %vm27_vm3, 1.0, %v301_v7  ;;  %v207_v9 = vsel %vm28_vm4, 1.0, %v301_v7  ;;  %vm29_vm6 = vcmp.lt.f32.partialorder %v25_v5, 0.014512472  ;;  %s303_s20 = smov 113  }
  0x16   :  { %vm30_vm7 = vcmp.lt.f32.partialorder %v26_v6, 0.014512472  ;;  %v44_v10 = vrot.slane %v206_v8, 7  ;;  %v46_v11 = vrot.slane %v207_v9, 7  ;;  %v63_v12 = vrot.slane %v206_v8, 1  ;;  %s304_s21 = smov 127  }
  0x17   :  { %v41_v2 = vadd.s32 8, %v40_v1  ;;  %vm48_vm0 = vcmp.lt.s32.totalorder %v40_v1, 1  ;;  %vm53_vm1 = vcmp.ge.s32.totalorder %v40_v1, 1  ;;  %vm67_vm2 = vcmp.lt.s32.totalorder %v40_v1, 7  ;;  %s305_s24 = smov 1.0   ;;  %s306_s28 = smov [#allocation5]  }
  0x18   :  { %v65_v13 = vrot.slane %v207_v9, 1  ;;  %v208_v14 = vsel %vm29_vm6, 1.0, %v301_v7  ;;  %v209_v15 = vsel %vm30_vm7, 1.0, %v301_v7  ;;  %v49_v16 = vsel %vm48_vm0, %v44_v10, %v46_v11  ;;  %s194_s29 = sshll.u32 %s306_s28, 4  ;;  %s195_s29 = int_to_ptr.vmem [resolvable:$true] %s194_s29 }
  0x19   :  { %vm73_vm5 = vcmp.lt.s32.totalorder %v41_v2, 15  ;;  %v51_v17 = vsel %vm48_vm0, %v46_v11, %v44_v10  ;;  %v60_v21 = vmax.f32 %v207_v9, %v49_v16  ;;  %v45_v23 = vrot.slane %v208_v14, 7  ;;  %s272_s30 = scalar_lea.vmem %s195_s29, 512  ;;  %p277_p9 = scmp.lt.s32.totalorder %s195_s29, %s195_s29 }
  0x1a   :  { %v68_v18 = vsel %vm67_vm2, %v63_v12, %v65_v13  ;;  %v70_v19 = vsel %vm67_vm2, %v65_v13, %v63_v12  ;;  %v55_v20 = vsel %vm53_vm1, %v51_v17, 0.0  ;;  %v47_v25 = vrot.slane %v209_v15, 7  ;;  %p273_p8 = scmp.ne.s32.totalorder %s195_s29, %s272_s30  ;;  %p278_p10 = scmp.lt.s32.totalorder %s272_s30, %s272_s30 }
  0x1b   :  { %v75_v22 = vsel %vm73_vm5, %v70_v19, 0.0  ;;  %v59_v24 = vmax.f32 %v206_v8, %v55_v20  ;;  %v64_v26 = vrot.slane %v208_v14, 1  ;;  %v66_v27 = vrot.slane %v209_v15, 1 }
  0x1c   :  { %v339_v28 = vmax.f32 %v60_v21, %v75_v22  ;;  %v50_v30 = vsel %vm48_vm0, %v45_v23, %v47_v25  ;;  %v52_v32 = vsel %vm48_vm0, %v47_v25, %v45_v23  ;;  %vm82_vm8 = vcmask 1047680   ;;  %p279_p11 = por %p278_p10, %p277_p9 }
  0x1d   :  { %v341_v29 = vmax.f32 %v59_v24, %v68_v18  ;;  %v71_v31 = vsel %vm67_vm2, %v66_v27, %v64_v26  ;;  %v62_v33 = vmax.f32 %v209_v15, %v50_v30  ;;  %v57_v35 = vsel %vm53_vm1, %v52_v32, 0.0 }
  0x1e   :  { %v77_v34 = vsel %vm73_vm5, %v71_v31, 0.0  ;;  %v69_v36 = vsel %vm67_vm2, %v64_v26, %v66_v27  ;;  %v61_v38 = vmax.f32 %v208_v14, %v57_v35  ;;  %v43_v62 = vand.u32 127, %v39_v0  ;;  %p280_p12 = pnand %p279_p11, %p273_p8 }
  0x1f   :  { %v223_v37 = vpack.i.bf16 %v339_v28, %v341_v29  ;;  %v351_v39 = vmax.f32 %v62_v33, %v77_v34  ;;  %vm157_vm11 = vcmask 130048  }
  0x20   :  { %v80_v40 = vmax.f32 %v61_v38, %v69_v36  ;;  %vm107_vm9 = vcmp.ge.s32.totalorder %v43_v62, 1  ;;  %vm132_vm10 = vcmp.lt.s32.totalorder %v43_v62, 15 }
  0x21   :  { %224 = vrot.lane.b32.xlu0 %v223_v37, %s302_s0  ;;  %92 = vrot.lane.b32.xlu1 %v351_v39, %s302_s0 }
  0x25   :  { %89 = vrot.lane.b32.xlu0 %v80_v40, %s302_s0 }
  0x93   :  { %v225_v41 = vpop.permute.xlu0 %224  ;;  %v93_v47 = vpop.permute.xlu1 %92 }
  0x94   :  { %v227_v42 = vunpack.i.h.bf16 %v225_v41  ;;  %v226_v43 = vunpack.i.l.bf16 %v225_v41  ;;  %v94_v50 = vsel %vm82_vm8, %v93_v47, %v351_v39 }
  0x96   :  { %v85_v44 = vsel %vm82_vm8, %v226_v43, %v341_v29  ;;  %v88_v45 = vsel %vm82_vm8, %v227_v42, %v339_v28 }
  0x97   :  { %v228_v46 = vpack.i.bf16 %v88_v45, %v85_v44  ;;  %v90_v48 = vpop.permute.xlu0 %89 }
  0x98   :  { %v91_v49 = vsel %vm82_vm8, %v90_v48, %v80_v40 }
  0x99   :  { %229 = vrot.lane.b32.xlu1 %v228_v46, %s302_s0  ;;  %99 = vrot.lane.b32.xlu0 %v91_v49, %s302_s0 }
  0x9d   :  { %101 = vrot.lane.b32.xlu1 %v94_v50, %s302_s0 }
 0x10b   :  { %v230_v51 = vpop.permute.xlu1 %229  ;;  %v100_v52 = vpop.permute.xlu0 %99 }
 0x10c   :  { %v232_v53 = vunpack.i.h.bf16 %v230_v51  ;;  %v231_v54 = vunpack.i.l.bf16 %v230_v51  ;;  %v105_v55 = vsel %vm82_vm8, %v100_v52, %v80_v40 }
 0x10e   :  { %v103_v56 = vsel %vm82_vm8, %v231_v54, %v341_v29  ;;  %v104_v57 = vsel %vm82_vm8, %v232_v53, %v339_v28 }
 0x10f   :  { %v102_v58 = vpop.permute.xlu1 %101  ;;  %v233_v59 = vpack.i.bf16 %v104_v57, %v103_v56 }
 0x110   :  { %v106_v60 = vsel %vm82_vm8, %v102_v58, %v351_v39 }
 0x111   :  { %v238_v61 = vpack.i.bf16 %v106_v60, %v105_v55  ;;  %234 = vrot.lane.b32.xlu0 %v233_v59, %s303_s20 }
 0x113   :  { %239 = vrot.lane.b32.xlu1 %v238_v61, %s303_s20 }
 0x115   :  { %244 = vrot.lane.b32.xlu0 %v233_v59, %s304_s21 }
 0x117   :  { %137 = vrot.lane.b32.xlu1 %v105_v55, %s304_s21 }
 0x119   :  { %139 = vrot.lane.b32.xlu0 %v106_v60, %s304_s21 }
 0x183   :  { %v235_v63 = vpop.permute.xlu0 %234 }
 0x184   :  { %v237_v1 = vunpack.i.h.bf16 %v235_v63  ;;  %v236_v2 = vunpack.i.l.bf16 %v235_v63 }
 0x185   :  { %v240_v3 = vpop.permute.xlu1 %239 }
 0x186   :  { %v125_v4 = vsel %vm107_vm9, %v237_v1, 0.0  ;;  %v124_v5 = vsel %vm107_vm9, %v236_v2, 0.0  ;;  %v242_v6 = vunpack.i.h.bf16 %v240_v3  ;;  %v241_v7 = vunpack.i.l.bf16 %v240_v3 }
 0x187   :  { %v245_v8 = vpop.permute.xlu0 %244  ;;  %v129_v13 = vmax.f32 %v339_v28, %v125_v4  ;;  %v128_v14 = vmax.f32 %v341_v29, %v124_v5 }
 0x188   :  { %v127_v9 = vsel %vm107_vm9, %v242_v6, 0.0  ;;  %v126_v10 = vsel %vm107_vm9, %v241_v7, 0.0  ;;  %v247_v11 = vunpack.i.h.bf16 %v245_v8  ;;  %v246_v12 = vunpack.i.l.bf16 %v245_v8 }
 0x189   :  { %v138_v0 = vpop.permute.xlu1 %137  ;;  %v130_v15 = vmax.f32 %v80_v40, %v126_v10  ;;  %v131_v16 = vmax.f32 %v351_v39, %v127_v9 }
 0x18a   :  { %v146_v17 = vsel %vm132_vm10, %v247_v11, 0.0  ;;  %v145_v18 = vsel %vm132_vm10, %v246_v12, 0.0  ;;  %v147_v19 = vsel %vm132_vm10, %v138_v0, 0.0 }
 0x18b   :  { %v149_v20 = vmax.f32 %v128_v14, %v145_v18  ;;  %v150_v21 = vmax.f32 %v129_v13, %v146_v17  ;;  %v151_v22 = vmax.f32 %v130_v15, %v147_v19  ;;  %v140_v23 = vpop.permute.xlu0 %139 }
 0x18c   :  { %v148_v24 = vsel %vm132_vm10, %v140_v23, 0.0 }
 0x18d   :  { %v153_v25 = vsub.f32 1.0, %v149_v20  ;;  %v154_v26 = vsub.f32 1.0, %v150_v21  ;;  %v155_v27 = vsub.f32 1.0, %v151_v22  ;;  %v152_v28 = vmax.f32 %v131_v16, %v148_v24 }
 0x18f   :  { %v156_v29 = vsub.f32 1.0, %v152_v28  ;;  %v158_v30 = vsel %vm157_vm11, %v153_v25, 0.0  ;;  %v159_v31 = vsel %vm157_vm11, %v154_v26, 0.0  ;;  %v161_v33 = vsel %vm157_vm11, %v155_v27, 0.0 }
 0x190   :  { %v160_v32 = vadd.f32 %v159_v31, %v158_v30 }
 0x191   :  { %v163_v35 = vsel %vm157_vm11, %v156_v29, 0.0 }
 0x192   :  { %v162_v34 = vadd.f32 %v161_v33, %v160_v32 }
 0x194   :  { %v164_v36 = vadd.f32 %v163_v35, %v162_v34 }
 0x196   :  { %165 = vadd.xlane.f32.xlu1 %v164_v36 }
 0x223   :  { %v166_v37 = vpop.xlane.xlu1 %165 }
 0x224   :  { %v167_v38 = vrot.slane %v166_v37, 4 }
 0x226   :  { %v168_v39 = vadd.f32 %v167_v38, %v166_v37 }
 0x228   :  { %v169_v40 = vrot.slane %v168_v39, 2 }
 0x22a   :  { %v170_v41 = vadd.f32 %v169_v40, %v168_v39 }
 0x22c   :  { %v171_v42 = vrot.slane %v170_v41, 1 }
 0x22e   :  { %v172_v43 = vadd.f32 %v171_v42, %v170_v41 }
 0x230   :  { %210 = vpush %v172_v43 }
 0x261   :  { %s211_s22 = spop %210 }
 0x262   :  { %s174_s23 = smul.f32 4.0, %s211_s22 }
 0x264   :  { %s175_s25 = smax.f32 %s305_s24, %s174_s23 }
 0x265   :  { %v176_v44 = vstv %s175_s25 }
 0x266   :  { %248 = vrcp.f32 %v176_v44 }
 0x270   :  { %v249_v45 = vpop.eup %248 }
 0x271   :  { %212 = vpush %v249_v45 }
 0x2a2   :  { %s213_s26 = spop %212 }
 0x2a3   :  { %s179_s27 = smul.f32 2048.0, %s213_s26 }
 0x2a5   :  { %v180_v46 = vstv %s179_s27 }
 0x2a6   :  { %v181_v47 = vmul.f32 %v180_v46, %v153_v25  ;;  %v182_v48 = vmul.f32 %v180_v46, %v154_v26  ;;  %v183_v49 = vmul.f32 %v180_v46, %v155_v27  ;;  %v184_v50 = vmul.f32 %v180_v46, %v156_v29 }
 0x2a8   :  { %185 = vst.msk [vmem:[#allocation5] sm:$0xff] %vm157_vm11, %v181_v47  ;;  %186 = vst.msk [vmem:[#allocation5 + $0x8] sm:$0xff] %vm157_vm11, %v182_v48 }
 0x2a9   :  { %187 = vst.msk [vmem:[#allocation5 + $0x10] sm:$0xff] %vm157_vm11, %v183_v49  ;;  %188 = vst.msk [vmem:[#allocation5 + $0x18] sm:$0xff] %vm157_vm11, %v184_v50 }
 0x2aa   :  { %283 = shalt.err (!%p280_p12)
}
 0x2ab   :  { %s284_s4 = scalar_lea.hbm %s400_s1, 512 }
 0x2ac   :  { %p285_p13 = scmp.ne.s32.totalorder %s400_s1, %s284_s4  ;;  %p288_p0 = scmp.lt.u32.totalorder %s284_s4, %s400_s1 }
 0x2ae   :  { %p290_p1 = pnand %p288_p0, %p285_p13 }
 0x2b0   :  { %293 = shalt.err (!%p290_p1)
}
 0x2b1   :  { %200 = dma.vmem_to_hbm [thread:$0]  %s195_s29, 512, %s400_s1, [#allocation4], %s299_s16, %s299_s16, %s300_s17  }
 0x2b2   :  { %296 = dma.done.wait [#allocation4], 512  }
 0x2b3   :  { %297 = vsyncadd [#allocation4], 4294966784 }
 0x2b4   :  { %204 = vsyncpa [#allocation3], 1 }
 0x2b5   :  { %205 = vsyncpa [#allocation4], 1 }

</bundles_post_ra>
